<compile_context>
chip_gen: v7x
topology: tpu7x:2x2x1
jax: 0.10.0
libtpu: 0.0.40
codegen_flags: <defaults>
</compile_context>

<pallas_src>
import math

import jax
import jax.numpy as jnp
import numpy as np
from jax import lax
from jax.experimental import pallas as pl
from jax.experimental.pallas import tpu as pltpu

# ----------------------------- module config --------------------------------
MUL = 8
BASE_DIM1 = 4       # 0e (1) + 1o (3)
BASE_DIM2 = 4
BASE_DIM_OUT = 4
NUM_PATHS = 4       # (0e,0e)->0e, (1o,1o)->0e, (0e,1o)->1o, (1o,0e)->1o
SCATTER_FACTOR = 0.5

# ------------------------------ tiling config --------------------------------
LANES = 128           # fused elements per lane row; component index = lane % 4
GROUP = BASE_DIM1     # 4 components per fused (edge, mul) element
MAX_TILE_ROWS = 4096  # (4096,128) f32 block = 2 MiB; 3 arrays * 2 bufs = 12 MiB VMEM
TARGET_STEPS = 4      # >=2 grid steps per TensorCore on v7x (2 TCs/chip)
VMEM_LIMIT_BYTES = 32 * 1024 * 1024


def build_w3j() -> jnp.ndarray:
    """w3j buffer (num_paths, base_dim1, base_dim2, base_dim_out).

    Real-basis wigner_3j constants for the (l1, l2, l_out) combinations used,
    already scaled by sqrt(2*l_out + 1) ("component" irrep_normalization),
    exactly as Contracter.__init__ assembles its `w3j` buffer.
    """
    w3j = np.zeros((NUM_PATHS, BASE_DIM1, BASE_DIM2, BASE_DIM_OUT), np.float32)
    # path 0: (0e, 0e) -> 0e : wigner_3j(0,0,0) = 1, norm sqrt(1)
    w3j[0, 0, 0, 0] = 1.0
    # path 1: (1o, 1o) -> 0e : wigner_3j(1,1,0)[i,j,0] = delta_ij/sqrt(3), norm sqrt(1)
    for i in range(3):
        w3j[1, 1 + i, 1 + i, 0] = 1.0 / math.sqrt(3.0)
    # path 2: (0e, 1o) -> 1o : wigner_3j(0,1,1)[0,j,k] = delta_jk/sqrt(3), norm sqrt(3)
    for j in range(3):
        w3j[2, 0, 1 + j, 1 + j] = 1.0
    # path 3: (1o, 0e) -> 1o : wigner_3j(1,0,1)[i,0,k] = delta_ik/sqrt(3), norm sqrt(3)
    for i in range(3):
        w3j[3, 1 + i, 0, 1 + i] = 1.0
    return jnp.asarray(w3j)


def validate_w3j_pattern(w3j_np: np.ndarray) -> None:
    """Host-side check that the w3j buffer matches the (1x0e+1x1o)^3 sparsity the
    kernel is specialized to (instructions=None, 'component' normalization, no
    path/channel coupling); raises otherwise instead of silently returning wrong
    results for other Contracter configurations."""
    if w3j_np.shape != (NUM_PATHS, BASE_DIM1, BASE_DIM2, BASE_DIM_OUT):
        raise ValueError(f"unexpected w3j shape {w3j_np.shape}")
    mask = np.zeros(w3j_np.shape, dtype=bool)
    mask[0, 0, 0, 0] = True
    for i in range(1, 4):
        mask[1, i, i, 0] = True   # (1o,1o) -> 0e diagonal
        mask[2, 0, i, i] = True   # (0e,1o) -> 1o
        mask[3, i, 0, i] = True   # (1o,0e) -> 1o
    if not np.allclose(w3j_np[~mask], 0.0, atol=1e-6):
        raise ValueError("w3j has nonzeros outside the specialized sparsity pattern")
    for p, vals in ((1, [w3j_np[1, i, i, 0] for i in range(1, 4)]),
                    (2, [w3j_np[2, 0, i, i] for i in range(1, 4)]),
                    (3, [w3j_np[3, i, 0, i] for i in range(1, 4)])):
        if not np.allclose(vals, vals[0], atol=1e-6):
            raise ValueError(f"w3j path {p} entries are not uniform; "
                             "per-path scalar coefficient assumption broken")


# ------------------------------ Pallas kernel --------------------------------
def _contract_kernel(coef_ref, x1_ref, x2_ref, o_ref):
    """Specialized strided-TP contraction in the native row-major layout.

    coef_ref : SMEM (4,) f32 = [c00, c11, c01, c10] (scatter_factor folded in)
               c00 = ww3j[0,0,0], c11 = ww3j[i,i,0] (i=1..3),
               c01 = ww3j[0,k,k], c10 = ww3j[k,0,k] (k=1..3)
    x1/x2/o  : VMEM (tile_rows, 128); lane l of a row holds component (l % 4)
               of fused element (row*32 + l//4).

    Per group of 4 lanes:
      out[0] = c00*x1_0*x2_0 + c11*(x1_1*x2_1 + x1_2*x2_2 + x1_3*x2_3)
      out[k] = c01*x1_0*x2_k + c10*x1_k*x2_0                    (k = 1..3)

    Pure VPU + XLU (no MXU: a 4x4x4 contraction would be <1% MXU utilization);
    the kernel is HBM-bandwidth bound so the 9 in-vreg lane rotations are free
    filler on the otherwise idle XLU slot.
    """
    # TODO(synk): specialized to the (1x0e+1x1o)^3 w3j sparsity of this module
    # config (validated host-side); other instruction sets would need a dense
    # contraction fallback.
    x1 = x1_ref[...].astype(jnp.float32)   # f32 accumulation on every generation
    x2 = x2_ref[...].astype(jnp.float32)

    c00 = coef_ref[0]
    c11 = coef_ref[1]
    c01 = coef_ref[2]
    c10 = coef_ref[3]

    comp = lax.broadcasted_iota(jnp.int32, x1.shape, 1) & (GROUP - 1)

    # p[l] = x1_c * x2_c for component c = l % 4 of the group.
    p = x1 * x2
    # Sum of p over components 1..3 of each group, landing on its component-0 lane
    # (positive shifts == -1/-2/-3 mod 128; stays within the group at used lanes).
    s123 = (pltpu.roll(p, LANES - 1, 1)
            + pltpu.roll(p, LANES - 2, 1)
            + pltpu.roll(p, LANES - 3, 1))
    out_scalar = c00 * p + c11 * s123                    # valid where comp == 0

    # Broadcast each group's component-0 value of x1/x2 onto its lanes 1..3.
    x1_0 = jnp.where(comp == 1, pltpu.roll(x1, 1, 1),
                     jnp.where(comp == 2, pltpu.roll(x1, 2, 1),
                               pltpu.roll(x1, 3, 1)))
    x2_0 = jnp.where(comp == 1, pltpu.roll(x2, 1, 1),
                     jnp.where(comp == 2, pltpu.roll(x2, 2, 1),
                               pltpu.roll(x2, 3, 1)))
    out_vec = c01 * x1_0 * x2 + c10 * x2_0 * x1          # valid where comp != 0

    # Single full-tile unmasked store.
    o_ref[...] = jnp.where(comp == 0, out_scalar, out_vec).astype(o_ref.dtype)


# ------------------------------ tiling helpers --------------------------------
def _round_up(a: int, b: int) -> int:
    return ((a + b - 1) // b) * b


def _min_tile_rows(dtype) -> int:
    # native sublane granularity: 8 for 4-byte, 16 for 2-byte, 32 for 1-byte dtypes
    return max(8, 32 // np.dtype(dtype).itemsize)


def _choose_tile_rows(rows: int, dtype) -> int:
    """Big blocks amortize the ~0.35us/step grid overhead (memory-bound op), but
    target >= TARGET_STEPS grid steps once there is enough work so (a) BlockSpec
    double-buffering overlaps DMA with compute and (b) on v7x both TensorCores
    get >= 2 steps each via dimension_semantics=("parallel",).  Tiny inputs take
    one (or two) blocks; a block equal to the full array dims is always legal."""
    mn = _min_tile_rows(dtype)
    if rows <= 4 * mn:
        return rows if rows <= mn else mn
    tile = _round_up(pl.cdiv(rows, TARGET_STEPS), mn)
    return min(tile, MAX_TILE_ROWS)


# ------------------------------ kernel wrapper --------------------------------
def contract_pallas(x1f: jnp.ndarray, x2f: jnp.ndarray, coefs: jnp.ndarray,
                    out_dtype=jnp.float32, tile_rows: int | None = None) -> jnp.ndarray:
    """Strided-TP contraction specialized to the 1x0e+1x1o irreps config.

    x1f, x2f : (NM, 4) row-major (NM = N * mul), any float dtype
    coefs    : (4,) f32 = [c00, c11, c01, c10] path-weighted w3j coefficients
    returns  : (NM, 4) in out_dtype
    """
    nm, d = x1f.shape
    assert d == BASE_DIM1 and x2f.shape == (nm, BASE_DIM2)
    total = nm * d
    rows = pl.cdiv(total, LANES)

    if total == rows * LANES:
        # N % 4 == 0 (common case): free row-major bitcast reshape, no HBM copy.
        x1v = x1f.reshape(rows, LANES)
        x2v = x2f.reshape(rows, LANES)
    else:
        # Ragged tail: pad the flat view up to a whole lane row (one extra copy
        # pass; only hit when N*mul*4 is not a multiple of 128).
        pad = rows * LANES - total
        x1v = jnp.pad(x1f.reshape(-1), (0, pad)).reshape(rows, LANES)
        x2v = jnp.pad(x2f.reshape(-1), (0, pad)).reshape(rows, LANES)

    if tile_rows is None:
        tile_rows = _choose_tile_rows(rows, x1v.dtype)
    grid_rows = pl.cdiv(rows, tile_rows)

    # Memory-bound: tell XLA so the surrounding scatter/gather glue can overlap.
    in_bytes = 2 * rows * LANES * x1v.dtype.itemsize
    out_bytes = rows * LANES * np.dtype(out_dtype).itemsize
    cost = pl.CostEstimate(flops=9 * rows * LANES, transcendentals=0,
                           bytes_accessed=int(in_bytes + out_bytes))

    out_v = pl.pallas_call(
        _contract_kernel,
        out_shape=jax.ShapeDtypeStruct((rows, LANES), out_dtype),
        grid_spec=pltpu.PrefetchScalarGridSpec(
            num_scalar_prefetch=0,
            grid=(grid_rows,),
            in_specs=[
                pl.BlockSpec(memory_space=pltpu.MemorySpace.SMEM),    # coefs (4,)
                pl.BlockSpec((tile_rows, LANES), lambda r: (r, 0)),   # x1 rows
                pl.BlockSpec((tile_rows, LANES), lambda r: (r, 0)),   # x2 rows
            ],
            out_specs=pl.BlockSpec((tile_rows, LANES), lambda r: (r, 0)),
        ),
        compiler_params=pltpu.CompilerParams(
            dimension_semantics=("parallel",),
            vmem_limit_bytes=VMEM_LIMIT_BYTES),
        cost_estimate=cost,
    )(coefs, x1v, x2v)

    out_flat = out_v.reshape(-1)
    if total != rows * LANES:
        out_flat = out_flat[:total]
    return out_flat.reshape(nm, d)


# ----------------------------- forward wrapper --------------------------------
def contracter_forward(x1, x2, idxs, scatter_dim_size, weights, w3j,
                       scatter_factor=SCATTER_FACTOR,
                       compute_dtype=jnp.float32, out_dtype=jnp.float32):
    """Mirrors Contracter.forward (non-diagonal w3j, no path/channel coupling).

    compute_dtype=jnp.bfloat16 halves the kernel's HBM input traffic (the op is
    purely bandwidth-bound); accumulation inside the kernel stays f32.
    out_dtype=jnp.bfloat16 additionally halves output traffic when the consumer
    tolerates it.
    """
    # Host-side specialization check (skipped when w3j is a tracer under jit).
    try:
        w3j_np = np.asarray(jax.device_get(w3j))
    except Exception:
        w3j_np = None
    if w3j_np is not None:
        validate_w3j_pattern(w3j_np)

    # scatter_factor is folded into the path coefficients below (scatter-add and
    # gather are linear), saving one full HBM read+write pass over x2.
    # TODO(synk): scatter-add + index_select are data-dependent indexing and stay
    # in XLA glue; fusing the gather into the kernel would need a per-edge grid,
    # which conflicts with the fused lane-dense layout used here.
    x2_scatter = jnp.zeros((scatter_dim_size,) + x2.shape[1:], x2.dtype)
    x2_scatter = x2_scatter.at[idxs].add(x2)
    x2 = x2_scatter[idxs]

    # ww3j = einsum('p,pijk->ijk', weights, w3j); for this irreps config it has
    # exactly 4 distinct coefficients -> ship them as SMEM scalars.
    ww3j = jnp.einsum('p,pijk->ijk', weights, w3j)
    coefs = jnp.stack([ww3j[0, 0, 0], ww3j[1, 1, 0],
                       ww3j[0, 1, 1], ww3j[1, 0, 1]]).astype(jnp.float32)
    if scatter_factor is not None:
        coefs = coefs * jnp.float32(scatter_factor)

    n = x1.shape[0]
    x1f = x1.reshape(n * MUL, BASE_DIM1)
    x2f = x2.reshape(n * MUL, BASE_DIM2)
    if x1f.dtype != jnp.dtype(compute_dtype):
        # TODO(synk): this cast is an extra HBM pass; feed bf16 activations from
        # the producer to get the bandwidth win for free.
        x1f = x1f.astype(compute_dtype)
        x2f = x2f.astype(compute_dtype)

    out = contract_pallas(x1f, x2f, coefs, out_dtype=out_dtype)
    return out.reshape(n, MUL, BASE_DIM_OUT)


# -------------------------- pure-JAX reference -------------------------------
def contracter_reference(x1, x2, idxs, scatter_dim_size, weights, w3j,
                         scatter_factor=SCATTER_FACTOR,
                         compute_dtype=jnp.float32):
    if scatter_factor is not None:
        x2 = scatter_factor * x2
    x2_scatter = jnp.zeros((scatter_dim_size,) + x2.shape[1:], x2.dtype)
    x2_scatter = x2_scatter.at[idxs].add(x2)
    x2 = x2_scatter[idxs]
    x1 = x1.reshape(-1, MUL, BASE_DIM1).astype(compute_dtype).astype(jnp.float32)
    x2 = x2.reshape(-1, MUL, BASE_DIM2).astype(compute_dtype).astype(jnp.float32)
    ww3j = jnp.einsum('p,pijk->ijk', weights, w3j)
    outer = x1[..., :, None] * x2[..., None, :]            # (N, mul, d1, d2)
    return jnp.einsum('nuij,ijk->nuk', outer, ww3j)        # (N, mul, dout)


# ----------------------------------- main -------------------------------------
if __name__ == "__main__":
    key = jax.random.PRNGKey(0)
    k1, k2, k3, kw = jax.random.split(key, 4)

    N_EDGES = 60      # N % 4 == 0 -> free (N*32,)->(15,128) reshape; 2-step grid + partial block
    N_NODES = 5

    x1 = jax.random.normal(k1, (N_EDGES, MUL * BASE_DIM1), jnp.float32)
    x2 = jax.random.normal(k2, (N_EDGES, MUL * BASE_DIM2), jnp.float32)
    idxs = jax.random.randint(k3, (N_EDGES,), 0, N_NODES, dtype=jnp.int32)

    # weights ~ U(-sqrt(3), sqrt(3)), shape (num_paths,) (path_channel_coupling=False)
    weights = jax.random.uniform(kw, (NUM_PATHS,), jnp.float32,
                                 minval=-math.sqrt(3.0), maxval=math.sqrt(3.0))
    w3j = build_w3j()

    # f32 path (faithful to the torch module semantics)
    out = jax.block_until_ready(
        contracter_forward(x1, x2, idxs, N_NODES, weights, w3j))
    ref = jax.block_until_ready(
        contracter_reference(x1, x2, idxs, N_NODES, weights, w3j))
    assert out.shape == (N_EDGES, MUL, BASE_DIM_OUT)
    assert np.allclose(np.asarray(out), np.asarray(ref), rtol=1e-5, atol=1e-5)

    # ragged case (N % 4 != 0 -> flat-pad path + partial final lane row)
    n2, nodes2 = 7, 3
    out2 = jax.block_until_ready(
        contracter_forward(x1[:n2], x2[:n2], idxs[:n2] % nodes2, nodes2, weights, w3j))
    ref2 = jax.block_until_ready(
        contracter_reference(x1[:n2], x2[:n2], idxs[:n2] % nodes2, nodes2, weights, w3j))
    assert out2.shape == (n2, MUL, BASE_DIM_OUT)
    assert np.allclose(np.asarray(out2), np.asarray(ref2), rtol=1e-5, atol=1e-5)

    # bf16-input fast path (memory-bound win on v6e/v7x); the reference quantizes
    # its inputs identically, so only f32 accumulation order differs.
    out_bf = jax.block_until_ready(
        contracter_forward(x1, x2, idxs, N_NODES, weights, w3j,
                           compute_dtype=jnp.bfloat16))
    ref_bf = jax.block_until_ready(
        contracter_reference(x1, x2, idxs, N_NODES, weights, w3j,
                             compute_dtype=jnp.bfloat16))
    assert np.allclose(np.asarray(out_bf), np.asarray(ref_bf), rtol=1e-4, atol=1e-4)

    print("KERNEL_OK")
</pallas_src>

<mosaic_0001>
module attributes {stable_mosaic.version = 11 : i64} {
  func.func @_contract_kernel(%arg0: i32, %arg1: memref<4xf32, #tpu.memory_space<smem>>, %arg2: memref<8x128xf32, #tpu.memory_space<vmem>>, %arg3: memref<8x128xf32, #tpu.memory_space<vmem>>, %arg4: memref<8x128xf32, #tpu.memory_space<vmem>>) attributes {dimension_semantics = [#tpu.dimension_semantics<parallel>], iteration_bounds = array<i64: 2>, scalar_prefetch = 0 : i64, scratch_operands = 0 : i64, tpu.core_type = #tpu.core_type<tc>, window_params = [{transform_indices = @transform_0, window_bounds = array<i64: 4>}, {transform_indices = @transform_1, window_bounds = array<i64: 8, 128>}, {transform_indices = @transform_2, window_bounds = array<i64: 8, 128>}, {transform_indices = @transform_3, window_bounds = array<i64: 8, 128>}]} {
    %c0 = arith.constant 0 : index
    %c0_0 = arith.constant 0 : index
    %0 = vector.load %arg2[%c0, %c0_0] : memref<8x128xf32, #tpu.memory_space<vmem>>, vector<8x128xf32>
    %c0_1 = arith.constant 0 : index
    %c0_2 = arith.constant 0 : index
    %1 = vector.load %arg3[%c0_1, %c0_2] : memref<8x128xf32, #tpu.memory_space<vmem>>, vector<8x128xf32>
    %c0_3 = arith.constant 0 : index
    %2 = memref.load %arg1[%c0_3] : memref<4xf32, #tpu.memory_space<smem>>
    %c1 = arith.constant 1 : index
    %3 = memref.load %arg1[%c1] : memref<4xf32, #tpu.memory_space<smem>>
    %c2 = arith.constant 2 : index
    %4 = memref.load %arg1[%c2] : memref<4xf32, #tpu.memory_space<smem>>
    %c3 = arith.constant 3 : index
    %5 = memref.load %arg1[%c3] : memref<4xf32, #tpu.memory_space<smem>>
    %6 = tpu.iota {dimensions = array<i32: 1>} : vector<8x128xi32>
    %c3_i32 = arith.constant 3 : i32
    %7 = vector.broadcast %c3_i32 : i32 to vector<8x128xi32>
    %8 = arith.andi %6, %7 : vector<8x128xi32>
    %9 = arith.mulf %0, %1 : vector<8x128xf32>
    %c127_i32 = arith.constant 127 : i32
    %10 = tpu.dynamic_rotate %9 by %c127_i32 dim 1 : vector<8x128xf32>, i32 -> vector<8x128xf32>
    %c126_i32 = arith.constant 126 : i32
    %11 = tpu.dynamic_rotate %9 by %c126_i32 dim 1 : vector<8x128xf32>, i32 -> vector<8x128xf32>
    %12 = arith.addf %10, %11 : vector<8x128xf32>
    %c125_i32 = arith.constant 125 : i32
    %13 = tpu.dynamic_rotate %9 by %c125_i32 dim 1 : vector<8x128xf32>, i32 -> vector<8x128xf32>
    %14 = arith.addf %12, %13 : vector<8x128xf32>
    %15 = vector.broadcast %2 : f32 to vector<8x128xf32>
    %16 = arith.mulf %15, %9 : vector<8x128xf32>
    %17 = vector.broadcast %3 : f32 to vector<8x128xf32>
    %18 = arith.mulf %17, %14 : vector<8x128xf32>
    %19 = arith.addf %16, %18 : vector<8x128xf32>
    %c1_i32 = arith.constant 1 : i32
    %20 = vector.broadcast %c1_i32 : i32 to vector<8x128xi32>
    %21 = arith.cmpi eq, %8, %20 : vector<8x128xi32>
    %c1_i32_4 = arith.constant 1 : i32
    %22 = tpu.dynamic_rotate %0 by %c1_i32_4 dim 1 : vector<8x128xf32>, i32 -> vector<8x128xf32>
    %c2_i32 = arith.constant 2 : i32
    %23 = vector.broadcast %c2_i32 : i32 to vector<8x128xi32>
    %24 = arith.cmpi eq, %8, %23 : vector<8x128xi32>
    %c2_i32_5 = arith.constant 2 : i32
    %25 = tpu.dynamic_rotate %0 by %c2_i32_5 dim 1 : vector<8x128xf32>, i32 -> vector<8x128xf32>
    %c3_i32_6 = arith.constant 3 : i32
    %26 = tpu.dynamic_rotate %0 by %c3_i32_6 dim 1 : vector<8x128xf32>, i32 -> vector<8x128xf32>
    %27 = arith.select %24, %25, %26 : vector<8x128xi1>, vector<8x128xf32>
    %28 = arith.select %21, %22, %27 : vector<8x128xi1>, vector<8x128xf32>
    %c1_i32_7 = arith.constant 1 : i32
    %29 = vector.broadcast %c1_i32_7 : i32 to vector<8x128xi32>
    %30 = arith.cmpi eq, %8, %29 : vector<8x128xi32>
    %c1_i32_8 = arith.constant 1 : i32
    %31 = tpu.dynamic_rotate %1 by %c1_i32_8 dim 1 : vector<8x128xf32>, i32 -> vector<8x128xf32>
    %c2_i32_9 = arith.constant 2 : i32
    %32 = vector.broadcast %c2_i32_9 : i32 to vector<8x128xi32>
    %33 = arith.cmpi eq, %8, %32 : vector<8x128xi32>
    %c2_i32_10 = arith.constant 2 : i32
    %34 = tpu.dynamic_rotate %1 by %c2_i32_10 dim 1 : vector<8x128xf32>, i32 -> vector<8x128xf32>
    %c3_i32_11 = arith.constant 3 : i32
    %35 = tpu.dynamic_rotate %1 by %c3_i32_11 dim 1 : vector<8x128xf32>, i32 -> vector<8x128xf32>
    %36 = arith.select %33, %34, %35 : vector<8x128xi1>, vector<8x128xf32>
    %37 = arith.select %30, %31, %36 : vector<8x128xi1>, vector<8x128xf32>
    %38 = vector.broadcast %4 : f32 to vector<8x128xf32>
    %39 = arith.mulf %38, %28 : vector<8x128xf32>
    %40 = arith.mulf %39, %1 : vector<8x128xf32>
    %41 = vector.broadcast %5 : f32 to vector<8x128xf32>
    %42 = arith.mulf %41, %37 : vector<8x128xf32>
    %43 = arith.mulf %42, %0 : vector<8x128xf32>
    %44 = arith.addf %40, %43 : vector<8x128xf32>
    %c0_i32 = arith.constant 0 : i32
    %45 = vector.broadcast %c0_i32 : i32 to vector<8x128xi32>
    %46 = arith.cmpi eq, %8, %45 : vector<8x128xi32>
    %47 = arith.select %46, %19, %44 : vector<8x128xi1>, vector<8x128xf32>
    %c0_12 = arith.constant 0 : index
    %c0_13 = arith.constant 0 : index
    %48 = vector.load %arg4[%c0_12, %c0_13] : memref<8x128xf32, #tpu.memory_space<vmem>>, vector<8x128xf32>
    tpu.vector_store %arg4[%c0_12, %c0_13], %47 {strides = array<i32>} : memref<8x128xf32, #tpu.memory_space<vmem>>, vector<8x128xf32>,
    return
  }
  func.func @transform_0(%arg0: i32) -> i32 {
    %c0_i32 = arith.constant 0 : i32
    %c0_i32_0 = arith.constant 0 : i32
    return %c0_i32 : i32
  }
  func.func @transform_1(%arg0: i32) -> (i32, i32) {
    %c0_i32 = arith.constant 0 : i32
    %c0_i32_0 = arith.constant 0 : i32
    return %arg0, %c0_i32 : i32, i32
  }
  func.func @transform_2(%arg0: i32) -> (i32, i32) {
    %c0_i32 = arith.constant 0 : i32
    %c0_i32_0 = arith.constant 0 : i32
    return %arg0, %c0_i32 : i32, i32
  }
  func.func @transform_3(%arg0: i32) -> (i32, i32) {
    %c0_i32 = arith.constant 0 : i32
    %c0_i32_0 = arith.constant 0 : i32
    return %arg0, %c0_i32 : i32, i32
  }
}

</mosaic_0001>

<bundles_post_ra>
// kernel: tpu_custom_call.1
= control target key start
LH: loop header
LB: loop body
LE: loop exit
PB: predicated region body
PF: predicated region fallthrough
CT: control target
= control target key end

     0   :  { %8 = vsyncpa [#allocation5], 0  ;;  %s912_s0 = inlined_call_operand.hbm [shape: f32[4], index: 0, kind: input, shape index: {}]   ;;  %s913_s1 = inlined_call_operand.hbm [shape: f32[15,128], index: 1, kind: input, shape index: {}]   ;;  %s914_s2 = inlined_call_operand.hbm [shape: f32[15,128], index: 2, kind: input, shape index: {}]   ;;  %s915_s3 = inlined_call_operand.hbm [shape: f32[15,128], index: 3, kind: output, shape index: {}]  }
   0x1   :  { %9 = vsyncpa [#allocation3], 0 }
   0x2   :  { %11 = vsyncpa [#allocation3 + $0x1], 0 }
   0x3   :  { %12 = vsyncpa [#allocation8], 0 }
   0x4   :  { %14 = vsyncpa [#allocation8 + $0x1], 0 }
   0x5   :  { %15 = vsyncpa [#allocation4], 0 }
   0x6   :  { %17 = vsyncpa [#allocation4 + $0x1], 0  ;;  %s672_s12 = smov 0   ;;  %s674_s13 = smov 0  }
   0x7   :  { %s676_s14 = smov 0   ;;  %s678_s15 = smov 0  }
   0x8 LB: > { %s693_s16 = sadd.s32 4294967295, %s640_s15   ;;  %s405_s17 = sadd.s32 4294967294, %s640_s15   ;;  %s640_s15 = sphi %s678_s15, %s937_s15   ;;  %s636_s14 = sphi %s676_s14, %s936_s14   ;;  %s632_s13 = sphi %s674_s13, %s935_s13   ;;  %s628_s12 = sphi %s672_s12, %s934_s12  }
   0x9   : > { %s697_s18 = sadd.s32 1, %s640_s15   ;;  %s51_s19 = sadd.s32 1, %s636_s14 }
   0xa   : > { %s48_s20 = ssub.s32 %s640_s15, %s697_s18  ;;  %p58_p0 = scmp.ne.s32.totalorder %s636_s14, %s632_s13 }
   0xb   : > { %p49_p1 = scmp.eq.s32.totalorder %s48_s20, 0  ;;  %p64_p2 = scmp.ne.s32.totalorder %s632_s13, %s628_s12 }
   0xc   : > { %p916_p3 = scmp.eq.s32.totalorder %s693_s16, 0  ;;  %p114_p4 = scmp.eq.s32.totalorder %s693_s16, 1 }
   0xd   : > { %s709_s21 = scalar_select %p49_p1, %s636_s14, %s51_s19  }
   0xe   : > { %p713_p5 = por %p916_p3, %p64_p2  ;;  %p720_p6 = por %p114_p4, %p58_p0 }
   0xf   : > { %p120_p7 = scmp.eq.s32.totalorder %s405_s17, 1  ;;  %p406_p8 = scmp.ge.s32.totalorder %s640_s15, 1 }
  0x10   : > { %s920_s22 = scalar_select %p713_p5, 1, 0 }
  0x11   : > { %s921_s23 = scalar_select %p720_p6, 1, 0 }
  0x12   : > { %p127_p9 = scmp.lt.s32.totalorder %s640_s15, 3  ;;  %p726_p10 = por %p120_p7, %p64_p2 }
  0x13   : > { %p59_p13 = scmp.eq.s32.totalorder %s640_s15, 0  ;;  %p451_p1 = scmp.lt.s32.totalorder %s640_s15, 2 }
  0x14   : > { %s922_s24 = scalar_select %p726_p10, 1, 0 }
  0x15   : > { %p730_p11 = pnand %p406_p8, %p127_p9  ;;  %s740_s26 = sand.u32 1, %s636_s14  }
  0x16   : > { %p745_p3 = por %p59_p13, %p58_p0  ;;  %p925_p2 = scmp.eq.s32.totalorder %s693_s16, 0 }
  0x17   : > { %s923_s25 = scalar_select %p730_p11, 1, 0 }
  0x18   : > { %p435_p4 = pneg %p730_p11  ;;  %s409_s28 = sshll.u32 %s740_s26, 3 }
  0x19   : > { %s410_s29 = sshll.u32 %s640_s15, 7  ;;  %s493_s8 = scalar_lea.hbm %s912_s0, 16 }
  0x1a   : > { %p436_p7 = pnand %p435_p4, %p925_p2  ;;  %s758_s5 = scalar_lea.hbm %s913_s1, %s410_s29 }
  0x1b   : > { %p494_p0 = scmp.ne.s32.totalorder %s912_s0, %s493_s8  ;;  %p500_p4 = scmp.lt.u32.totalorder %s493_s8, %s912_s0 }
  0x1c   : > { %p495_p8 = pneg %p436_p7 }
  0x1e   : > { %p496_p9 = pnand %p495_p8, %p494_p0 }
  0x20   : > { %p497_p13 = pneg %p496_p9 }
  0x22   : > { %p502_p2 = pnand %p500_p4, %p497_p13 }
  0x24   : > { %505 = shalt.err (!%p502_p2)
}
  0x25   : > { %s642_s19 = smov [#allocation2]   ;;  %s153_s4 = scalar_lea.vmem [#allocation6], %s409_s28 }
  0x26   : > { %438 = dma.hbm_to_smem (!%p436_p7), %s912_s0, 16, %s642_s19, [#allocation5]  }
  0x27   : > { %s160_s6 = sshll.u32 %s153_s4, 4  ;;  %p778_p0 = pnand %p451_p1, %p745_p3  ;;  %s782_s6 = int_to_ptr.vmem [resolvable:$true] %s160_s6 }
  0x28   : > { %s150_s8 = scalar_lea.sflag [#allocation3], %s740_s26  ;;  %s506_s9 = scalar_lea.hbm %s758_s5, 128 }
  0x29   : > { %p507_p8 = scmp.ne.s32.totalorder %s758_s5, %s506_s9  ;;  %p508_p9 = pneg %p778_p0 }
  0x2a   : > { %s511_s11 = scalar_lea.hbm %s913_s1, 256  ;;  %p512_p3 = scmp.lt.u32.totalorder %s758_s5, %s913_s1 }
  0x2b   : > { %p509_p7 = pnand %p508_p9, %p507_p8  ;;  %p513_p1 = scmp.lt.u32.totalorder %s511_s11, %s506_s9 }
  0x2c   : > { %p515_p2 = scmp.lt.u32.totalorder %s506_s9, %s758_s5 }
  0x2d   : > { %p510_p13 = pneg %p509_p7  ;;  %p514_p4 = por %p513_p1, %p512_p3 }
  0x2f   : > { %p516_p12 = por %p515_p2, %p514_p4 }
  0x31   : > { %p517_p10 = pnand %p516_p12, %p510_p13 }
  0x33   : > { %520 = shalt.err (!%p517_p10)
}
  0x34   : > { %s521_s20 = scalar_lea.vmem %s782_s6, 128  ;;  %s643_s30 = smov [#allocation6]  }
  0x35   : > { %p522_p8 = scmp.ne.s32.totalorder %s782_s6, %s521_s20  ;;  %s526_s4 = sshll.u32 %s643_s30, 4  ;;  %s527_s4 = int_to_ptr.vmem [resolvable:$false] %s526_s4 }
  0x36   : > { %s528_s10 = scalar_lea.vmem %s527_s4, 256  ;;  %p529_p5 = scmp.lt.s32.totalorder %s782_s6, %s527_s4 }
  0x37   : > { %p524_p7 = pnand %p522_p8, %p508_p9  ;;  %p530_p3 = scmp.lt.s32.totalorder %s528_s10, %s521_s20 }
  0x39   : > { %p525_p6 = pneg %p524_p7  ;;  %p531_p1 = por %p530_p3, %p529_p5 }
  0x3b   : > { %p532_p4 = pnand %p531_p1, %p525_p6 }
  0x3d   : > { %535 = shalt.err (!%p532_p4)
}
  0x3e   : > { %442 = dma.hbm_to_vmem [thread:$0]  (!%p778_p0), %s758_s5, 128, %s782_s6, %s150_s8  }
  0x3f   : > { %s815_s11 = scalar_lea.hbm %s914_s2, %s410_s29  ;;  %s171_s17 = scalar_lea.vmem [#allocation7], %s409_s28 }
  0x40   : > { %s178_s19 = sshll.u32 %s171_s17, 4  ;;  %s168_s20 = scalar_lea.sflag [#allocation8], %s740_s26  ;;  %s179_s19 = int_to_ptr.vmem [resolvable:$true] %s178_s19 }
  0x41   : > { %s536_s30 = scalar_lea.hbm %s815_s11, 128  ;;  %s541_s29 = scalar_lea.hbm %s914_s2, 256 }
  0x42   : > { %p537_p5 = scmp.ne.s32.totalorder %s815_s11, %s536_s30  ;;  %p542_p12 = scmp.lt.u32.totalorder %s815_s11, %s914_s2 }
  0x43   : > { %p543_p13 = scmp.lt.u32.totalorder %s541_s29, %s536_s30  ;;  %p545_p8 = scmp.lt.u32.totalorder %s536_s30, %s815_s11 }
  0x44   : > { %p539_p6 = pnand %p537_p5, %p508_p9 }
  0x45   : > { %p544_p2 = por %p543_p13, %p542_p12 }
  0x46   : > { %p540_p10 = pneg %p539_p6 }
  0x47   : > { %p546_p7 = por %p545_p8, %p544_p2 }
  0x49   : > { %p547_p3 = pnand %p546_p7, %p540_p10 }
  0x4b   : > { %550 = shalt.err (!%p547_p3)
}
  0x4c   : > { %s551_s26 = scalar_lea.vmem %s179_s19, 128  ;;  %s644_s28 = smov [#allocation7]  }
  0x4d   : > { %p552_p1 = scmp.ne.s32.totalorder %s179_s19, %s551_s26  ;;  %s556_s10 = sshll.u32 %s644_s28, 4  ;;  %s557_s10 = int_to_ptr.vmem [resolvable:$false] %s556_s10 }
  0x4e   : > { %s558_s9 = scalar_lea.vmem %s557_s10, 256  ;;  %p559_p6 = scmp.lt.s32.totalorder %s179_s19, %s557_s10 }
  0x4f   : > { %p554_p4 = pnand %p552_p1, %p508_p9  ;;  %p560_p11 = scmp.lt.s32.totalorder %s558_s9, %s551_s26 }
  0x51   : > { %p555_p5 = pneg %p554_p4  ;;  %p561_p12 = por %p560_p11, %p559_p6 }
  0x53   : > { %p562_p13 = pnand %p561_p12, %p555_p5 }
  0x55   : > { %565 = shalt.err (!%p562_p13)
}
  0x56   : > { %445 = dma.hbm_to_vmem [thread:$0]  (!%p778_p0), %s815_s11, 128, %s179_s19, %s168_s20  }
  0x57   : > { %p927_p10 = scmp.ne.s32.totalorder %s923_s25, 0 }
  0x58   : > { %p928_p2 = scmp.eq.s32.totalorder (!%p927_p10), %s693_s16, 0 }
  0x59   : > { %187 = sbr.rel (%p927_p10) target bundleno = 260 (0x104), region = 32 }
  0x60   : > { %611 = dma.done.wait (%p928_p2), [#allocation5], 16   ;;  %p929_p9 = pmov %p928_p2 }
  0x61   : > { %s846_s27 = sand.u32 1, %s632_s13   ;;  %p930_p11 = scmp.ne.s32.totalorder %s920_s22, 0 }
  0x62   : > { %613 = vsyncadd (%p929_p9), [#allocation5], 4294967280  ;;  %s849_s17 = sshll.u32 %s846_s27, 3  ;;  %s194_s7 = scalar_lea.sflag [#allocation3], %s846_s27 }
  0x63   : > { %s197_s11 = scalar_lea.vmem [#allocation6], %s849_s17 }
  0x64   : > { %615 = dma.done.wait (%p930_p11), %s194_s7, 128  }
  0x65   : > { %617 = vsyncadd (%p930_p11), %s194_s7, 4294967168  ;;  %s203_s25 = scalar_lea.sflag [#allocation8], %s846_s27  ;;  %s206_s19 = scalar_lea.vmem [#allocation7], %s849_s17 }
  0x66   : > { %619 = dma.done.wait (%p930_p11), %s203_s25, 128  }
  0x67   : > { %621 = vsyncadd (%p930_p11), %s203_s25, 4294967168 }
  0x68   : > { %211 = sfence }
  0x69   : > { %v235_v0 = vld [vmem:[%s197_s11] sm:$0xff]  ;;  %v236_v1 = vld [vmem:[%s206_s19] sm:$0xff]  ;;  %s645_s20 = smov 2   ;;  %s646_s30 = smov 127   ;;  %v241_v3 = vlaneseq }
  0x6a   : > { %262 = vrot.lane.b32.xlu1 %v235_v0, %s645_s20  ;;  %v244_v2 = vmul.f32 %v236_v1, %v235_v0  ;;  %s647_s5 = smov 3   ;;  %s648_s6 = smov 126  }
  0x6b   : > { %s649_s29 = smov 1   ;;  %s650_s8 = smov 125   ;;  %v242_v6 = vand.u32 127, %v241_v3 }
  0x6c   : > { %245 = vrot.lane.b32.xlu0 %v244_v2, %s646_s30  ;;  %s419_s22 = sld [smem:[#allocation2 + $0x2]]  ;;  %s420_s4 = sld [smem:[#allocation2 + $0x3]] }
  0x6d   : > { %v243_v8 = vand.u32 3, %v242_v6  ;;  %s237_s26 = sld [smem:[#allocation2]]  ;;  %s418_s28 = sld [smem:[#allocation2 + $0x1]] }
  0x6e   : > { %264 = vrot.lane.b32.xlu1 %v235_v0, %s647_s5  ;;  %s422_s10 = sshll.u32 %s693_s16, 7  ;;  %s234_s9 = scalar_lea.vmem [#allocation9], %s849_s17 }
  0x6f   : > { %vm261_vm0 = vcmp.eq.s32.totalorder %v243_v8, 2  ;;  %vm258_vm1 = vcmp.eq.s32.totalorder %v243_v8, 1  ;;  %s300_s7 = sshll.u32 %s234_s9, 4  ;;  %vm283_vm2 = vcmp.eq.s32.totalorder %v243_v8, 0  ;;  %s868_s19 = scalar_lea.hbm %s915_s3, %s422_s10  ;;  %s870_s7 = int_to_ptr.vmem [resolvable:$true] %s300_s7 }
  0x70   : > { %247 = vrot.lane.b32.xlu0 %v244_v2, %s648_s6  ;;  %s566_s30 = scalar_lea.vmem %s870_s7, 128  ;;  %p931_p8 = scmp.ne.s32.totalorder %s921_s23, 0 }
  0x71   : > { %p567_p0 = scmp.ne.s32.totalorder %s870_s7, %s566_s30  ;;  %s651_s16 = smov [#allocation9]  }
  0x72   : > { %272 = vrot.lane.b32.xlu1 %v236_v1, %s647_s5  ;;  %v276_v14 = vstv %s419_s22  ;;  %v279_v16 = vstv %s420_s4  ;;  %s570_s17 = sshll.u32 %s651_s16, 4  ;;  %s571_s17 = int_to_ptr.vmem [resolvable:$false] %s570_s17 }
  0x73   : > { %v253_v21 = vstv %s237_s26  ;;  %v255_v24 = vstv %s418_s28  ;;  %p568_p7 = pnand %p567_p0, %p931_p8  ;;  %s572_s5 = scalar_lea.vmem %s571_s17, 256 }
  0x74   : > { %270 = vrot.lane.b32.xlu0 %v236_v1, %s645_s20  ;;  %v254_v28 = vmul.f32 %v253_v21, %v244_v2  ;;  %s287_s20 = scalar_lea.sflag [#allocation4], %s846_s27  ;;  %p573_p1 = scmp.lt.s32.totalorder %s870_s7, %s571_s17 }
  0x75   : > { %p569_p3 = pneg %p568_p7  ;;  %p574_p4 = scmp.lt.s32.totalorder %s572_s5, %s566_s30 }
  0x76   : > { %268 = vrot.lane.b32.xlu1 %v236_v1, %s649_s29 }
  0x77   : > { %p575_p5 = por %p574_p4, %p573_p1 }
  0x78   : > { %259 = vrot.lane.b32.xlu0 %v235_v0, %s649_s29 }
  0x79   : > { %p576_p6 = pnand %p575_p5, %p569_p3 }
  0x7c   : > { %250 = vrot.lane.b32.xlu0 %v244_v2, %s650_s8 }
  0xdc   : > { %v263_v4 = vpop.permute.xlu1 %262 }
  0xde   : > { %v246_v5 = vpop.permute.xlu0 %245 }
  0xe0   : > { %v265_v7 = vpop.permute.xlu1 %264 }
  0xe1   : > { %v266_v15 = vsel %vm261_vm0, %v263_v4, %v265_v7 }
  0xe2   : > { %v248_v9 = vpop.permute.xlu0 %247 }
  0xe3   : > { %v249_v22 = vadd.f32 %v248_v9, %v246_v5 }
  0xe4   : > { %v273_v10 = vpop.permute.xlu1 %272 }
  0xe6   : > { %v271_v11 = vpop.permute.xlu0 %270 }
  0xe7   : > { %v274_v12 = vsel %vm261_vm0, %v271_v11, %v273_v10 }
  0xe8   : > { %v269_v13 = vpop.permute.xlu1 %268 }
  0xe9   : > { %v275_v17 = vsel %vm258_vm1, %v269_v13, %v274_v12 }
  0xea   : > { %v260_v18 = vpop.permute.xlu0 %259  ;;  %v280_v23 = vmul.f32 %v279_v16, %v275_v17 }
  0xeb   : > { %v267_v19 = vsel %vm258_vm1, %v260_v18, %v266_v15 }
  0xec   : > { %v277_v20 = vmul.f32 %v276_v14, %v267_v19  ;;  %v281_v29 = vmul.f32 %v280_v23, %v235_v0 }
  0xee   : > { %v251_v25 = vpop.permute.xlu0 %250  ;;  %v278_v26 = vmul.f32 %v277_v20, %v236_v1 }
  0xef   : > { %v252_v27 = vadd.f32 %v251_v25, %v249_v22 }
  0xf0   : > { %v282_v31 = vadd.f32 %v281_v29, %v278_v26 }
  0xf1   : > { %v256_v30 = vmul.f32 %v255_v24, %v252_v27 }
  0xf3   : > { %v257_v32 = vadd.f32 %v256_v30, %v254_v28 }
  0xf5   : > { %v284_v33 = vsel %vm283_vm2, %v257_v32, %v282_v31 }
  0xf6   : > { %285 = vst [vmem:[%s234_s9] sm:$0xff] %v284_v33 }
  0xf7   : > { %579 = shalt.err (!%p576_p6)
}
  0xf8   : > { %s580_s27 = scalar_lea.hbm %s868_s19, 128  ;;  %s584_s8 = scalar_lea.hbm %s915_s3, 256 }
  0xf9   : > { %p581_p12 = scmp.ne.s32.totalorder %s868_s19, %s580_s27  ;;  %p585_p2 = scmp.lt.u32.totalorder %s868_s19, %s915_s3 }
  0xfa   : > { %p586_p9 = scmp.lt.u32.totalorder %s584_s8, %s580_s27  ;;  %p588_p0 = scmp.lt.u32.totalorder %s580_s27, %s868_s19 }
  0xfb   : > { %p582_p13 = pnand %p581_p12, %p931_p8 }
  0xfc   : > { %p587_p11 = por %p586_p9, %p585_p2 }
  0xfd   : > { %p583_p10 = pneg %p582_p13 }
  0xfe   : > { %p589_p7 = por %p588_p0, %p587_p11 }
 0x100   : > { %p590_p3 = pnand %p589_p7, %p583_p10 }
 0x102   : > { %593 = shalt.err (!%p590_p3)
}
 0x103   : > { %433 = dma.vmem_to_hbm [thread:$0]  (%p931_p8), %s870_s7, 128, %s868_s19, %s287_s20  }
 0x104 PF: > { %s312_s26 = sand.u32 1, %s628_s12   ;;  %p932_p1 = scmp.ne.s32.totalorder %s922_s24, 0 }
 0x105   : > { %p933_p4 = scmp.ge.s32.totalorder %s640_s15, 2  ;;  %s313_s28 = scalar_lea.sflag [#allocation4], %s312_s26 }
 0x107   : > { %p447_p5 = pnand %p933_p4, %p932_p1 }
 0x109   : > { %623 = dma.done.wait (!%p447_p5), %s313_s28, 128  }
 0x10a   : > { %625 = vsyncadd (!%p447_p5), %s313_s28, 4294967168  ;;  %p20_p6 = scmp.ge.s32.totalorder %s697_s18, 4   ;;  %s934_s12 = smov %s632_s13 }
 0x10b   : > { %s935_s13 = smov %s636_s14  ;;  %s936_s14 = smov %s709_s21 }
 0x10c   : > { %s937_s15 = smov %s697_s18  ;;  %22 = sbr.rel (!%p20_p6) target bundleno = 8 (0x8), region = 95 }
 0x113   :  { %318 = vsyncpa [#allocation3], 1 }
 0x114   :  { %320 = vsyncpa [#allocation3 + $0x1], 1 }
 0x115   :  { %321 = vsyncpa [#allocation8], 1 }
 0x116   :  { %323 = vsyncpa [#allocation8 + $0x1], 1 }
 0x117   :  { %324 = vsyncpa [#allocation4], 1 }
 0x118   :  { %326 = vsyncpa [#allocation4 + $0x1], 1 }
 0x119   :  { %327 = vsyncpa [#allocation5], 1 }
 0x11a   :  { %329 = vsyncpa [#allocation5 + $0x1], 1 }

</bundles_post_ra>
